<compile_context>
chip_gen: v5e
topology: v5e:2x2
jax: 0.10.0
libtpu: 0.0.40
codegen_flags: <defaults>
</compile_context>

<pallas_src>
import jax
import jax.numpy as jnp
from jax.experimental import pallas as pl
from jax.experimental.pallas import tpu as pltpu

LANE = 128
NEG_BIG = -1e30  # large finite negative (not -inf) -> no inf-inf/NaN in (logits - max)


def _round_up(x, m):
    return ((x + m - 1) // m) * m


def policy_mlp_kernel(x_ref, w1_ref, b1_ref, w2_ref, b2_ref, w3_ref, b3_ref, o_ref):
    """One batch tile: 3 matmuls (MXU, bf16 in / f32 acc), ReLU (VPU), softmax (VPU/EUP/XLU)."""
    # obs arrives f32; cast to bf16 in-kernel (VPU) for the MXU.
    x = x_ref[...].astype(jnp.bfloat16)  # (TB, obs_dim)

    # Linear(obs_dim -> h1) + ReLU  (f32 accumulate, f32 bias/ReLU)
    h1 = jnp.dot(x, w1_ref[...], preferred_element_type=jnp.float32) + b1_ref[...]
    h1 = jnp.maximum(h1, 0.0).astype(jnp.bfloat16)

    # Linear(h1 -> h2) + ReLU
    h2 = jnp.dot(h1, w2_ref[...], preferred_element_type=jnp.float32) + b2_ref[...]
    h2 = jnp.maximum(h2, 0.0).astype(jnp.bfloat16)

    # Linear(h2 -> act_pad)  (act_pad = 128-lane-padded act_dim; padded cols biased to -1e30)
    logits = jnp.dot(h2, w3_ref[...], preferred_element_type=jnp.float32) + b3_ref[...]

    # Numerically stable softmax over the last dim (== torch.nn.Softmax(dim=-1)).
    # Padded columns: exp(-1e30 - m) == 0 exactly, so real-column probabilities are unchanged.
    m = jnp.max(logits, axis=-1, keepdims=True)
    e = jnp.exp(logits - m)
    denom = jnp.sum(e, axis=-1, keepdims=True)
    # Exact reciprocal: rows sum to 1 for downstream sampling / log-prob computations.
    o_ref[...] = e * pl.reciprocal(denom, approx=False)


def prepare_params(params, act_dim, lane_pad=LANE):
    """One-time weight prep (call once per policy update, reuse across forward calls):
    bf16-cast the matmul weights and lane-pad the output layer to `lane_pad` columns."""
    act_pad = _round_up(max(act_dim, 1), lane_pad)
    w1 = params["w1"].astype(jnp.bfloat16)
    w2 = params["w2"].astype(jnp.bfloat16)
    b1 = params["b1"].astype(jnp.float32)
    b2 = params["b2"].astype(jnp.float32)
    w3 = jnp.pad(params["w3"], ((0, 0), (0, act_pad - act_dim))).astype(jnp.bfloat16)
    b3 = jnp.pad(params["b3"].astype(jnp.float32), ((0, 0), (0, act_pad - act_dim)),
                 constant_values=NEG_BIG)
    return {"w1": w1, "b1": b1, "w2": w2, "b2": b2, "w3": w3, "b3": b3,
            "act_dim": act_dim, "act_pad": act_pad}


def policy_network_forward(obs, prepped, *, batch_tile=1024, bucket=True):
    """obs: (B, obs_dim) f32; prepped: output of prepare_params (static across calls)."""
    w1, b1, w2, b2, w3, b3 = (prepped[k] for k in ("w1", "b1", "w2", "b2", "w3", "b3"))
    act_dim, act_pad = prepped["act_dim"], prepped["act_pad"]
    B, obs_dim = obs.shape

    # Bucket B (next power of two) so Bp / tb / grid are stable across ragged RL batches.
    Bb = max(8, pl.next_power_of_2(B)) if bucket else _round_up(B, 8)
    # >= 2 parallel tiles whenever possible (both v7x TensorCores), but keep tiles large
    # (cap batch_tile) so the serial grid loop on v5e/v6e has few fixed-cost steps.
    if Bb >= 16:
        tb = min(batch_tile, _round_up(pl.cdiv(Bb, 2), 8))
    else:
        tb = Bb
    Bp = _round_up(Bb, tb)
    if Bp != B:
        obs = jnp.pad(obs, ((0, Bp - B), (0, 0)))
    grid = (Bp // tb,)

    const2 = lambda i: (0, 0)  # weights/biases: same block every grid step -> VMEM-resident
    out = pl.pallas_call(
        policy_mlp_kernel,
        out_shape=jax.ShapeDtypeStruct((Bp, act_pad), jnp.float32),
        grid=grid,
        in_specs=[
            pl.BlockSpec((tb, obs_dim), lambda i: (i, 0)),
            pl.BlockSpec(w1.shape, const2),
            pl.BlockSpec(b1.shape, const2),
            pl.BlockSpec(w2.shape, const2),
            pl.BlockSpec(b2.shape, const2),
            pl.BlockSpec(w3.shape, const2),
            pl.BlockSpec(b3.shape, const2),
        ],
        out_specs=pl.BlockSpec((tb, act_pad), lambda i: (i, 0)),
        compiler_params=pltpu.CompilerParams(
            dimension_semantics=("parallel",),  # megacore sharding on v7x; no-op on v5e/v6e
        ),
    )(obs, w1, b1, w2, b2, w3, b3)
    return out[:B, :act_dim]


def init_params(key, obs_dim, act_dim, hidden_size=(64, 64)):
    """Deterministic init mimicking nn.Linear's uniform(-1/sqrt(fan_in), 1/sqrt(fan_in))."""
    dims = [obs_dim, *hidden_size, act_dim]
    params = {}
    for i in range(3):
        fan_in, fan_out = dims[i], dims[i + 1]
        key, kw, kb = jax.random.split(key, 3)
        bound = 1.0 / jnp.sqrt(fan_in)
        params[f"w{i+1}"] = jax.random.uniform(
            kw, (fan_in, fan_out), jnp.float32, -bound, bound
        )
        params[f"b{i+1}"] = jax.random.uniform(
            kb, (1, fan_out), jnp.float32, -bound, bound
        )
    return params


def reference_forward(obs, params):
    h = jnp.maximum(obs @ params["w1"] + params["b1"], 0.0)
    h = jnp.maximum(h @ params["w2"] + params["b2"], 0.0)
    logits = h @ params["w3"] + params["b3"]
    return jax.nn.softmax(logits, axis=-1)


if __name__ == "__main__":
    obs_dim, act_dim = 16, 4

    key = jax.random.PRNGKey(0)
    key, k_small, k_big = jax.random.split(key, 3)
    params = init_params(key, obs_dim, act_dim, hidden_size=(64, 64))
    prepped = prepare_params(params, act_dim)  # one-time bf16 cast + lane-pad of w3/b3

    # Small per-step batch (single grid step).
    obs_small = jax.random.normal(k_small, (8, obs_dim), jnp.float32)
    out_small = jax.block_until_ready(policy_network_forward(obs_small, prepped))
    ref_small = reference_forward(obs_small, params)
    assert out_small.shape == (8, act_dim)
    # bf16 matmul inputs -> loosened tolerance vs f32 reference.
    assert jnp.allclose(out_small, ref_small, atol=2e-2, rtol=2e-2)
    assert jnp.allclose(jnp.sum(out_small, axis=-1), jnp.ones((8,)), atol=1e-3)

    # Ragged rollout-sized batch: buckets to 1024 -> 2 parallel tiles of 512 rows.
    B_big = 1000
    obs_big = jax.random.normal(k_big, (B_big, obs_dim), jnp.float32)
    out_big = jax.block_until_ready(policy_network_forward(obs_big, prepped))
    ref_big = reference_forward(obs_big, params)
    assert out_big.shape == (B_big, act_dim)
    assert jnp.allclose(out_big, ref_big, atol=2e-2, rtol=2e-2)
    assert jnp.allclose(jnp.sum(out_big, axis=-1), jnp.ones((B_big,)), atol=1e-3)

    print("KERNEL_OK")
</pallas_src>

<mosaic_0001>
module attributes {stable_mosaic.version = 11 : i64} {
  func.func @policy_mlp_kernel(%arg0: i32, %arg1: memref<8x16xf32, #tpu.memory_space<vmem>>, %arg2: memref<16x64xbf16, #tpu.memory_space<vmem>>, %arg3: memref<1x64xf32, #tpu.memory_space<vmem>>, %arg4: memref<64x64xbf16, #tpu.memory_space<vmem>>, %arg5: memref<1x64xf32, #tpu.memory_space<vmem>>, %arg6: memref<64x128xbf16, #tpu.memory_space<vmem>>, %arg7: memref<1x128xf32, #tpu.memory_space<vmem>>, %arg8: memref<8x128xf32, #tpu.memory_space<vmem>>) attributes {dimension_semantics = [#tpu.dimension_semantics<parallel>], iteration_bounds = array<i64: 1>, scalar_prefetch = 0 : i64, scratch_operands = 0 : i64, tpu.core_type = #tpu.core_type<tc>, window_params = [{transform_indices = @transform_0, window_bounds = array<i64: 8, 16>}, {pipeline_mode = #tpu.pipeline_mode<synchronous>, transform_indices = @transform_1, window_bounds = array<i64: 16, 64>}, {pipeline_mode = #tpu.pipeline_mode<synchronous>, transform_indices = @transform_2, window_bounds = array<i64: 1, 64>}, {pipeline_mode = #tpu.pipeline_mode<synchronous>, transform_indices = @transform_3, window_bounds = array<i64: 64, 64>}, {pipeline_mode = #tpu.pipeline_mode<synchronous>, transform_indices = @transform_4, window_bounds = array<i64: 1, 64>}, {pipeline_mode = #tpu.pipeline_mode<synchronous>, transform_indices = @transform_5, window_bounds = array<i64: 64, 128>}, {pipeline_mode = #tpu.pipeline_mode<synchronous>, transform_indices = @transform_6, window_bounds = array<i64: 1, 128>}, {transform_indices = @transform_7, window_bounds = array<i64: 8, 128>}]} {
    %c0 = arith.constant 0 : index
    %c0_0 = arith.constant 0 : index
    %0 = vector.load %arg1[%c0, %c0_0] : memref<8x16xf32, #tpu.memory_space<vmem>>, vector<8x16xf32>
    %1 = arith.truncf %0 : vector<8x16xf32> to vector<8x16xbf16>
    %c0_1 = arith.constant 0 : index
    %c0_2 = arith.constant 0 : index
    %2 = vector.load %arg2[%c0_1, %c0_2] : memref<16x64xbf16, #tpu.memory_space<vmem>>, vector<16x64xbf16>
    %cst = arith.constant dense<0.000000e+00> : vector<8x64xf32>
    %3 = tpu.matmul %1, %2, %cst {dimension_numbers = #tpu.dot_dimension_numbers<[1], [0], [0], [1], [0, 0, 1, 1], [], []>} : vector<8x16xbf16>, vector<16x64xbf16>, vector<8x64xf32> -> vector<8x64xf32>
    %c0_3 = arith.constant 0 : index
    %c0_4 = arith.constant 0 : index
    %4 = vector.load %arg3[%c0_3, %c0_4] : memref<1x64xf32, #tpu.memory_space<vmem>>, vector<1x64xf32>
    %5 = vector.broadcast %4 : vector<1x64xf32> to vector<8x64xf32>
    %6 = arith.addf %3, %5 : vector<8x64xf32>
    %cst_5 = arith.constant 0.000000e+00 : f32
    %7 = vector.broadcast %cst_5 : f32 to vector<8x64xf32>
    %8 = arith.maximumf %6, %7 : vector<8x64xf32>
    %9 = arith.truncf %8 : vector<8x64xf32> to vector<8x64xbf16>
    %c0_6 = arith.constant 0 : index
    %c0_7 = arith.constant 0 : index
    %10 = vector.load %arg4[%c0_6, %c0_7] : memref<64x64xbf16, #tpu.memory_space<vmem>>, vector<64x64xbf16>
    %cst_8 = arith.constant dense<0.000000e+00> : vector<8x64xf32>
    %11 = tpu.matmul %9, %10, %cst_8 {dimension_numbers = #tpu.dot_dimension_numbers<[1], [0], [0], [1], [0, 0, 1, 1], [], []>} : vector<8x64xbf16>, vector<64x64xbf16>, vector<8x64xf32> -> vector<8x64xf32>
    %c0_9 = arith.constant 0 : index
    %c0_10 = arith.constant 0 : index
    %12 = vector.load %arg5[%c0_9, %c0_10] : memref<1x64xf32, #tpu.memory_space<vmem>>, vector<1x64xf32>
    %13 = vector.broadcast %12 : vector<1x64xf32> to vector<8x64xf32>
    %14 = arith.addf %11, %13 : vector<8x64xf32>
    %cst_11 = arith.constant 0.000000e+00 : f32
    %15 = vector.broadcast %cst_11 : f32 to vector<8x64xf32>
    %16 = arith.maximumf %14, %15 : vector<8x64xf32>
    %17 = arith.truncf %16 : vector<8x64xf32> to vector<8x64xbf16>
    %c0_12 = arith.constant 0 : index
    %c0_13 = arith.constant 0 : index
    %18 = vector.load %arg6[%c0_12, %c0_13] : memref<64x128xbf16, #tpu.memory_space<vmem>>, vector<64x128xbf16>
    %cst_14 = arith.constant dense<0.000000e+00> : vector<8x128xf32>
    %19 = tpu.matmul %17, %18, %cst_14 {dimension_numbers = #tpu.dot_dimension_numbers<[1], [0], [0], [1], [0, 0, 1, 1], [], []>} : vector<8x64xbf16>, vector<64x128xbf16>, vector<8x128xf32> -> vector<8x128xf32>
    %c0_15 = arith.constant 0 : index
    %c0_16 = arith.constant 0 : index
    %20 = vector.load %arg7[%c0_15, %c0_16] : memref<1x128xf32, #tpu.memory_space<vmem>>, vector<1x128xf32>
    %21 = vector.broadcast %20 : vector<1x128xf32> to vector<8x128xf32>
    %22 = arith.addf %19, %21 : vector<8x128xf32>
    %cst_17 = arith.constant dense<0xFF800000> : vector<8xf32>
    %23 = vector.multi_reduction <maximumf>, %22, %cst_17 [1] : vector<8x128xf32> to vector<8xf32>
    %24 = vector.shape_cast %23 : vector<8xf32> to vector<8x1xf32>
    %25 = vector.broadcast %24 : vector<8x1xf32> to vector<8x128xf32>
    %26 = arith.subf %22, %25 : vector<8x128xf32>
    %27 = math.exp %26 : vector<8x128xf32>
    %cst_18 = arith.constant dense<0.000000e+00> : vector<8xf32>
    %28 = vector.multi_reduction <add>, %27, %cst_18 [1] : vector<8x128xf32> to vector<8xf32>
    %29 = vector.shape_cast %28 : vector<8xf32> to vector<8x1xf32>
    %30 = tpu.reciprocal %29 : vector<8x1xf32> -> vector<8x1xf32>
    %31 = vector.broadcast %30 : vector<8x1xf32> to vector<8x128xf32>
    %32 = arith.mulf %27, %31 : vector<8x128xf32>
    %c0_19 = arith.constant 0 : index
    %c0_20 = arith.constant 0 : index
    %33 = vector.load %arg8[%c0_19, %c0_20] : memref<8x128xf32, #tpu.memory_space<vmem>>, vector<8x128xf32>
    tpu.vector_store %arg8[%c0_19, %c0_20], %32 {strides = array<i32>} : memref<8x128xf32, #tpu.memory_space<vmem>>, vector<8x128xf32>,
    return
  }
  func.func @transform_0(%arg0: i32) -> (i32, i32) {
    %c0_i32 = arith.constant 0 : i32
    %c0_i32_0 = arith.constant 0 : i32
    return %arg0, %c0_i32 : i32, i32
  }
  func.func @transform_1(%arg0: i32) -> (i32, i32) {
    %c0_i32 = arith.constant 0 : i32
    %c0_i32_0 = arith.constant 0 : i32
    %c0_i32_1 = arith.constant 0 : i32
    return %c0_i32, %c0_i32_0 : i32, i32
  }
  func.func @transform_2(%arg0: i32) -> (i32, i32) {
    %c0_i32 = arith.constant 0 : i32
    %c0_i32_0 = arith.constant 0 : i32
    %c0_i32_1 = arith.constant 0 : i32
    return %c0_i32, %c0_i32_0 : i32, i32
  }
  func.func @transform_3(%arg0: i32) -> (i32, i32) {
    %c0_i32 = arith.constant 0 : i32
    %c0_i32_0 = arith.constant 0 : i32
    %c0_i32_1 = arith.constant 0 : i32
    return %c0_i32, %c0_i32_0 : i32, i32
  }
  func.func @transform_4(%arg0: i32) -> (i32, i32) {
    %c0_i32 = arith.constant 0 : i32
    %c0_i32_0 = arith.constant 0 : i32
    %c0_i32_1 = arith.constant 0 : i32
    return %c0_i32, %c0_i32_0 : i32, i32
  }
  func.func @transform_5(%arg0: i32) -> (i32, i32) {
    %c0_i32 = arith.constant 0 : i32
    %c0_i32_0 = arith.constant 0 : i32
    %c0_i32_1 = arith.constant 0 : i32
    return %c0_i32, %c0_i32_0 : i32, i32
  }
  func.func @transform_6(%arg0: i32) -> (i32, i32) {
    %c0_i32 = arith.constant 0 : i32
    %c0_i32_0 = arith.constant 0 : i32
    %c0_i32_1 = arith.constant 0 : i32
    return %c0_i32, %c0_i32_0 : i32, i32
  }
  func.func @transform_7(%arg0: i32) -> (i32, i32) {
    %c0_i32 = arith.constant 0 : i32
    %c0_i32_0 = arith.constant 0 : i32
    return %arg0, %c0_i32 : i32, i32
  }
}

</mosaic_0001>

<bundles_post_ra>
// kernel: tpu_custom_call.1
= control target key start
LH: loop header
LB: loop body
LE: loop exit
PB: predicated region body
PF: predicated region fallthrough
CT: control target
= control target key end

     0   :  { %12 = vsyncpa [#allocation3], 0  ;;  %s532_s0 = inlined_call_operand.hbm [shape: f32[8,16], index: 0, kind: input, shape index: {}]   ;;  %s533_s1 = inlined_call_operand.hbm [shape: bf16[16,64], index: 1, kind: input, shape index: {}]   ;;  %s534_s2 = inlined_call_operand.vmem [shape: f32[1,64], index: 2, kind: input, shape index: {}]   ;;  %s535_s3 = inlined_call_operand.hbm [shape: bf16[64,64], index: 3, kind: input, shape index: {}]   ;;  %s536_s4 = inlined_call_operand.vmem [shape: f32[1,64], index: 4, kind: input, shape index: {}]   ;;  %s537_s5 = inlined_call_operand.hbm [shape: bf16[64,128], index: 5, kind: input, shape index: {}]   ;;  %s538_s6 = inlined_call_operand.vmem [shape: f32[1,128], index: 6, kind: input, shape index: {}]   ;;  %s539_s7 = inlined_call_operand.hbm [shape: f32[8,128], index: 7, kind: output, shape index: {}]  }
   0x1   :  { %13 = vsyncpa [#allocation6], 0 }
   0x2   :  { %14 = vsyncpa [#allocation9], 0  ;;  %s31_s26 = sshll.u32 %s533_s1, 4  ;;  %s32_s26 = int_to_ptr.hbm [resolvable:$true] %s31_s26 }
   0x3   :  { %15 = vsyncpa [#allocation4], 0  ;;  %s461_s27 = smov [#allocation5]   ;;  %s21_s8 = sshll.u32 %s532_s0, 4  ;;  %s22_s8 = int_to_ptr.hbm [resolvable:$true] %s21_s8 }
   0x4   :  { %s33_s28 = sshll.u32 %s461_s27, 4  ;;  %s462_s9 = smov 64   ;;  %s34_s28 = int_to_ptr.vmem [resolvable:$true] %s33_s28 }
   0x5   :  { %s463_s10 = smov 4   ;;  %s464_s11 = smov [#allocation2]  }
   0x6   :  { %39 = dma.hbm_to_vmem [thread:$0]  %s32_s26, 128, %s34_s28, [#allocation6], %s462_s9, %s462_s9, %s463_s10  }
   0x7   :  { %s23_s12 = sshll.u32 %s464_s11, 4  ;;  %s46_s15 = sshll.u32 %s535_s3, 4  ;;  %s24_s12 = int_to_ptr.vmem [resolvable:$true] %s23_s12  ;;  %s47_s15 = int_to_ptr.hbm [resolvable:$true] %s46_s15 }
   0x8   :  { %26 = dma.hbm_to_vmem [thread:$0]  %s22_s8, 128, %s24_s12, [#allocation3]  }
   0x9   :  { %s61_s17 = sshll.u32 %s537_s5, 4  ;;  %s465_s18 = smov [#allocation7]   ;;  %s62_s17 = int_to_ptr.hbm [resolvable:$true] %s61_s17 }
   0xa   :  { %s48_s19 = sshll.u32 %s465_s18, 4  ;;  %s466_s0 = smov [#allocation8]   ;;  %s49_s19 = int_to_ptr.vmem [resolvable:$true] %s48_s19 }
   0xb   :  { %54 = dma.hbm_to_vmem [thread:$0]  %s47_s15, 512, %s49_s19, [#allocation6], %s462_s9, %s462_s9, %s463_s10  }
   0xc   :  { %s63_s20 = sshll.u32 %s466_s0, 4  ;;  %s64_s20 = int_to_ptr.vmem [resolvable:$true] %s63_s20 }
   0xd   :  { %69 = dma.hbm_to_vmem [thread:$0]  %s62_s17, 512, %s64_s20, [#allocation9], %s462_s9, %s462_s9, %s463_s10  }
   0xe   :  { %453 = dma.done.wait [#allocation3], 128  }
   0xf   :  { %454 = vsyncadd [#allocation3], 4294967168 }
  0x10   :  { %455 = dma.done.wait [#allocation6], 640  }
  0x11   :  { %456 = vsyncadd [#allocation6], 4294966656 }
  0x12   :  { %457 = dma.done.wait [#allocation9], 512  }
  0x13   :  { %458 = vsyncadd [#allocation9], 4294966784  ;;  %v310_v0 = vld [vmem:[#allocation5] sm:$0xff]  ;;  %v89_v1 = vld [vmem:[#allocation2] sm:$0xff]  ;;  %vm103_vm0 = vcmask 130048   ;;  %vm158_vm1 = vcmask 523264  }
  0x14   :  { %v314_v2 = vld [vmem:[#allocation7 + $0x18] sm:$0xff]  ;;  %v90_v3 = vpack.c.bf16 %v89_v1, %v89_v1  ;;  %114 = vmatpush.bf16.msra.mxu0 %v310_v0  ;;  %v313_v4 = vld [vmem:[#allocation7 + $0x10] sm:$0xff]  ;;  %v312_v5 = vld [vmem:[#allocation7 + $0x8] sm:$0xff]  ;;  %s259_s26 = sshll.u32 %s539_s7, 4  ;;  %s260_s26 = int_to_ptr.hbm [resolvable:$true] %s259_s26 }
  0x15   :  { %166 = vmatpush.bf16.msra.mxu1 %v314_v2  ;;  %v311_v6 = vld [vmem:[#allocation7] sm:$0xff]  ;;  %v318_v7 = vld [vmem:[#allocation8 + $0x18] sm:$0xff]  ;;  %v317_v8 = vld [vmem:[#allocation8 + $0x10] sm:$0xff] }
  0x16   :  { %220 = vmatpush.bf16.msra.mxu2 %v318_v7  ;;  %v326_v9 = vld [vmem:[%s534_s2] ss:$0 sm:$0xff]  ;;  %v316_v15 = vld [vmem:[#allocation8 + $0x8] sm:$0xff]  ;;  %v315_v16 = vld [vmem:[#allocation8] sm:$0xff] }
  0x17   :  { %275 = vmatmul.msk.bf16.vlgmr.msra.gmra.mxu0 %vm103_vm0, %v90_v3  ;;  %v327_v17 = vld [vmem:[%s536_s4] ss:$0 sm:$0xff]  ;;  %s467_s4 = smov [#allocation10]  }
  0x18   :  { %v328_v23 = vld [vmem:[%s538_s6] ss:$0 sm:$0xff]  ;;  %s257_s6 = sshll.u32 %s467_s4, 4  ;;  %s258_s6 = int_to_ptr.vmem [resolvable:$true] %s257_s6 }
  0x19   :  { %167 = vmatpush.bf16.msra.mxu1 %v313_v4 }
  0x1a   :  { %221 = vmatpush.bf16.msra.mxu2 %v317_v8 }
  0x1d   :  { %168 = vmatpush.bf16.msra.mxu1 %v312_v5 }
  0x1e   :  { %222 = vmatpush.bf16.msra.mxu2 %v316_v15 }
  0x21   :  { %169 = vmatpush.bf16.msra.mxu1 %v311_v6 }
  0x22   :  { %223 = vmatpush.bf16.msra.mxu2 %v315_v16 }
  0x94   :  { %v116_v10 = vpop.f32.mrf.mxu0 }
  0x95   :  { %v117_v11 = vadd.f32 %v326_v9, %v116_v10 }
  0x97   :  { %v120_v12 = vmax.f32 %v117_v11, 0.0 }
  0x99   :  { %v121_v13 = vpack.c.bf16 %v120_v12, %v120_v12 }
  0x9b   :  { %292 = vmatmul.msk.bf16.vlgmr.msra.gmra.mxu1 %vm158_vm1, %v121_v13 }
  0x9c   :  { %v118_v14 = vpop.f32.mrf.mxu0 }
 0x118   :  { %v171_v18 = vpop.f32.mrf.mxu1 }
 0x119   :  { %v172_v19 = vadd.f32 %v327_v17, %v171_v18 }
 0x11b   :  { %v175_v20 = vmax.f32 %v172_v19, 0.0 }
 0x11d   :  { %v176_v21 = vpack.c.bf16 %v175_v20, %v175_v20 }
 0x11f   :  { %309 = vmatmul.msk.bf16.vlgmr.msra.gmra.mxu2 %vm158_vm1, %v176_v21 }
 0x120   :  { %v173_v22 = vpop.f32.mrf.mxu1 }
 0x1a2   :  { %v225_v24 = vpop.f32.mrf.mxu2 }
 0x1a3   :  { %v226_v25 = vadd.f32 %v328_v23, %v225_v24 }
 0x1a5   :  { %229 = vmax.xlane.f32.xlu0 %v226_v25 }
 0x1aa   :  { %v227_v26 = vpop.f32.mrf.mxu2 }
 0x218   :  { %v230_v27 = vpop.xlane.xlu0 %229 }
 0x219   :  { %v231_v28 = vsub.f32 %v226_v25, %v230_v27 }
 0x21b   :  { %v232_v29 = vmul.f32 1.442695, %v231_v28 }
 0x21d   :  { %329 = vpow2.f32 %v232_v29 }
 0x223   :  { %v330_v30 = vpop.eup %329 }
 0x224   :  { %234 = vadd.xlane.f32.xlu0 %v330_v30 }
 0x297   :  { %v235_v31 = vpop.xlane.xlu0 %234 }
 0x298   :  { %331 = vrcp.f32 %v235_v31  ;;  %v247_v35 = vand.u32 2147483648, %v235_v31  ;;  %v245_v37 = vand.u32 2147483647, %v235_v31  ;;  %vm241_vm3 = vweird.f32 %v235_v31 }
 0x29a   :  { %v248_v39 = vor.u32 1.1754944e-38, %v247_v35  ;;  %vm246_vm5 = vcmp.eq.f32.partialorder %v245_v37, 8.507059e+37 }
 0x29e   :  { %v332_v32 = vpop.eup %331 }
 0x29f   :  { %v237_v33 = vmul.f32 %v332_v32, %v235_v31  ;;  %vm242_vm2 = vweird.f32 %v332_v32 }
 0x2a0   :  { %vm243_vm4 = vmor %vm241_vm3, %vm242_vm2 }
 0x2a1   :  { %v238_v34 = vsub.f32 1.0, %v237_v33 }
 0x2a3   :  { %v239_v36 = vmul.f32 %v332_v32, %v238_v34 }
 0x2a5   :  { %v240_v38 = vadd.f32 %v332_v32, %v239_v36 }
 0x2a7   :  { %v244_v40 = vsel %vm243_vm4, %v332_v32, %v240_v38 }
 0x2a8   :  { %v249_v41 = vsel %vm246_vm5, %v248_v39, %v244_v40 }
 0x2a9   :  { %v250_v42 = vmul.f32 %v330_v30, %v249_v41 }
 0x2ab   :  { %251 = vst [vmem:[#allocation10] sm:$0xff] %v250_v42 }
 0x2ac   :  { %262 = dma.vmem_to_hbm [thread:$0]  %s258_s6, 128, %s260_s26, [#allocation4]  }
 0x2ad   :  { %459 = dma.done.wait [#allocation4], 128  }
 0x2ae   :  { %460 = vsyncadd [#allocation4], 4294967168 }
 0x2af   :  { %267 = vsyncpa [#allocation3], 1 }
 0x2b0   :  { %268 = vsyncpa [#allocation6], 1 }
 0x2b1   :  { %269 = vsyncpa [#allocation9], 1 }
 0x2b2   :  { %270 = vsyncpa [#allocation4], 1 }

</bundles_post_ra>
